<compile_context>
chip_gen: v7x
topology: tpu7x:2x2x1
jax: 0.10.0
libtpu: 0.0.40
codegen_flags: <defaults>
</compile_context>

<pallas_src>
import jax
import jax.numpy as jnp
from jax.experimental import pallas as pl
from jax.experimental.pallas import tpu as pltpu

INPUT_DIM = 2
HIDDEN_DIM = 100
OUTPUT_DIM = 1
H_PAD = 128  # lane-aligned hidden width


def _round_up(n, m):
    return ((n + m - 1) // m) * m


def mlp_kernel(x_ref, w1_ref, b1_ref, w2_ref, b2_ref, w3_ref, b3_ref, o_ref):
    """relu(fc1) -> relu(fc2) -> fc3, hidden padded to 128 lanes, narrow output."""
    # fc1: K=2 contraction as two VPU broadcast-FMAs (frees the MXU).
    x0 = x_ref[:, 0:1]                      # (TB, 1)
    x1 = x_ref[:, 1:2]                      # (TB, 1)
    h1 = x0 * w1_ref[0:1, :] + x1 * w1_ref[1:2, :] + b1_ref[...]
    h1 = jnp.maximum(h1, 0.0)               # (TB, 128); pad cols are exactly 0

    # fc2: (TB,128) @ (128,128) — the only MXU consumer.
    h2 = jnp.dot(h1, w2_ref[...], preferred_element_type=jnp.float32)
    h2 = jnp.maximum(h2 + b2_ref[...], 0.0)  # pad cols remain 0

    # fc3 on VPU/XLU: elementwise mul with the K-padded (1,128) w3 row, then a
    # lane reduce.  Output block is (TB, 1) -> tiny HBM writeback.
    out = jnp.sum(h2 * w3_ref[...], axis=-1, keepdims=True) + b3_ref[...]
    o_ref[...] = out.astype(o_ref.dtype)


def pad_params(params):
    """Zero-pad hidden dims to 128 lanes ONCE (hoisted out of the forward path).

    Numerics are exact: relu(0)=0, zero weight rows/cols contribute nothing,
    and pad bias entries are 0.
    """
    w1, b1, w2, b2, w3, b3 = params
    w1p = jnp.zeros((INPUT_DIM, H_PAD), jnp.float32).at[:, :HIDDEN_DIM].set(w1)
    b1p = jnp.zeros((1, H_PAD), jnp.float32).at[:, :HIDDEN_DIM].set(b1)
    w2p = jnp.zeros((H_PAD, H_PAD), jnp.float32).at[:HIDDEN_DIM, :HIDDEN_DIM].set(w2)
    b2p = jnp.zeros((1, H_PAD), jnp.float32).at[:, :HIDDEN_DIM].set(b2)
    w3p = jnp.zeros((1, H_PAD), jnp.float32).at[0, :HIDDEN_DIM].set(w3[:, 0])
    b3p = b3.reshape(1, OUTPUT_DIM).astype(jnp.float32)            # (1, 1)
    return (w1p, b1p, w2p, b2p, w3p, b3p)


def function_approximation_forward(x, padded_params, *, tb=2048):
    """x: (B, INPUT_DIM) float32, padded_params from pad_params().
    Returns (B, OUTPUT_DIM) float32."""
    w1p, b1p, w2p, b2p, w3p, b3p = padded_params
    B = x.shape[0]

    # Batch tile: multiple of 8 sublanes, capped at `tb`.  If the batch is big
    # enough, keep the grid at >=2 steps so both v7x TensorCores get work.
    TB = max(8, min(tb, _round_up(B, 8)))
    if B > 16 and _round_up(B, TB) // TB < 2:
        TB = max(8, _round_up(_round_up(B, 8) // 2, 8))

    B_pad = _round_up(B, TB)
    if B_pad != B:
        x = jnp.zeros((B_pad, INPUT_DIM), x.dtype).at[:B].set(x)

    grid = (B_pad // TB,)

    def pinned(shape):
        return pl.BlockSpec(shape, lambda i: (0,) * len(shape))

    out = pl.pallas_call(
        mlp_kernel,
        out_shape=jax.ShapeDtypeStruct((B_pad, OUTPUT_DIM), jnp.float32),
        grid=grid,
        in_specs=[
            pl.BlockSpec((TB, INPUT_DIM), lambda i: (i, 0)),  # x, tiled on batch
            pinned((INPUT_DIM, H_PAD)),                        # W1 (resident)
            pinned((1, H_PAD)),                                # b1
            pinned((H_PAD, H_PAD)),                            # W2
            pinned((1, H_PAD)),                                # b2
            pinned((1, H_PAD)),                                # w3 row (K-padded)
            pinned((1, OUTPUT_DIM)),                           # b3 scalar
        ],
        out_specs=pl.BlockSpec((TB, OUTPUT_DIM), lambda i: (i, 0)),
        compiler_params=pltpu.CompilerParams(
            dimension_semantics=("parallel",),
            vmem_limit_bytes=32 * 1024 * 1024),
    )(x, w1p, b1p, w2p, b2p, w3p, b3p)

    return out[:B]


def init_params(key):
    """Deterministic init mimicking nn.Linear default (uniform +/- 1/sqrt(fan_in))."""
    ks = jax.random.split(key, 6)

    def linear(kw, kb, fan_in, fan_out):
        bound = 1.0 / jnp.sqrt(float(fan_in))
        w = jax.random.uniform(kw, (fan_in, fan_out), jnp.float32, -bound, bound)
        b = jax.random.uniform(kb, (1, fan_out), jnp.float32, -bound, bound)
        return w, b

    w1, b1 = linear(ks[0], ks[1], INPUT_DIM, HIDDEN_DIM)
    w2, b2 = linear(ks[2], ks[3], HIDDEN_DIM, HIDDEN_DIM)
    w3, b3 = linear(ks[4], ks[5], HIDDEN_DIM, OUTPUT_DIM)
    return (w1, b1, w2, b2, w3, b3)


def _reference(x, params):
    w1, b1, w2, b2, w3, b3 = params
    h = jnp.maximum(x @ w1 + b1, 0.0)
    h = jnp.maximum(h @ w2 + b2, 0.0)
    return h @ w3 + b3


if __name__ == "__main__":
    key = jax.random.PRNGKey(0)
    k_params, k_x1, k_x2 = jax.random.split(key, 3)
    params = init_params(k_params)
    padded = pad_params(params)          # hoisted: pad weights exactly once

    fwd = jax.jit(function_approximation_forward)

    # Small batch (single grid step).
    batch = 8
    x = jax.random.normal(k_x1, (batch, INPUT_DIM), dtype=jnp.float32)
    out = jax.block_until_ready(fwd(x, padded))
    ref = _reference(x, params)
    assert out.shape == (batch, OUTPUT_DIM)
    assert jnp.allclose(out, ref, atol=1e-5, rtol=1e-5)

    # Larger batch (multi-step parallel grid + batch padding path).
    batch2 = 1000
    x2 = jax.random.normal(k_x2, (batch2, INPUT_DIM), dtype=jnp.float32)
    out2 = jax.block_until_ready(fwd(x2, padded))
    ref2 = _reference(x2, params)
    assert out2.shape == (batch2, OUTPUT_DIM)
    assert jnp.allclose(out2, ref2, atol=1e-5, rtol=1e-5)

    print("KERNEL_OK")
</pallas_src>

<mosaic_0001>
module attributes {stable_mosaic.version = 11 : i64} {
  func.func @mlp_kernel(%arg0: i32, %arg1: memref<8x2xf32, #tpu.memory_space<vmem>>, %arg2: memref<2x128xf32, #tpu.memory_space<vmem>>, %arg3: memref<1x128xf32, #tpu.memory_space<vmem>>, %arg4: memref<128x128xf32, #tpu.memory_space<vmem>>, %arg5: memref<1x128xf32, #tpu.memory_space<vmem>>, %arg6: memref<1x128xf32, #tpu.memory_space<vmem>>, %arg7: memref<1x1xf32, #tpu.memory_space<vmem>>, %arg8: memref<8x1xf32, #tpu.memory_space<vmem>>) attributes {dimension_semantics = [#tpu.dimension_semantics<parallel>], iteration_bounds = array<i64: 1>, scalar_prefetch = 0 : i64, scratch_operands = 0 : i64, tpu.core_type = #tpu.core_type<tc>, window_params = [{transform_indices = @transform_0, window_bounds = array<i64: 8, 2>}, {pipeline_mode = #tpu.pipeline_mode<synchronous>, transform_indices = @transform_1, window_bounds = array<i64: 2, 128>}, {pipeline_mode = #tpu.pipeline_mode<synchronous>, transform_indices = @transform_2, window_bounds = array<i64: 1, 128>}, {pipeline_mode = #tpu.pipeline_mode<synchronous>, transform_indices = @transform_3, window_bounds = array<i64: 128, 128>}, {pipeline_mode = #tpu.pipeline_mode<synchronous>, transform_indices = @transform_4, window_bounds = array<i64: 1, 128>}, {pipeline_mode = #tpu.pipeline_mode<synchronous>, transform_indices = @transform_5, window_bounds = array<i64: 1, 128>}, {pipeline_mode = #tpu.pipeline_mode<synchronous>, transform_indices = @transform_6, window_bounds = array<i64: 1, 1>}, {transform_indices = @transform_7, window_bounds = array<i64: 8, 1>}]} {
    %c0 = arith.constant 0 : index
    %c0_0 = arith.constant 0 : index
    %0 = vector.load %arg1[%c0, %c0_0] : memref<8x2xf32, #tpu.memory_space<vmem>>, vector<8x1xf32>
    %c0_1 = arith.constant 0 : index
    %c1 = arith.constant 1 : index
    %1 = vector.load %arg1[%c0_1, %c1] : memref<8x2xf32, #tpu.memory_space<vmem>>, vector<8x1xf32>
    %c0_2 = arith.constant 0 : index
    %c0_3 = arith.constant 0 : index
    %2 = vector.load %arg2[%c0_2, %c0_3] : memref<2x128xf32, #tpu.memory_space<vmem>>, vector<1x128xf32>
    %3 = vector.broadcast %0 : vector<8x1xf32> to vector<8x128xf32>
    %4 = vector.broadcast %2 : vector<1x128xf32> to vector<8x128xf32>
    %5 = arith.mulf %3, %4 : vector<8x128xf32>
    %c1_4 = arith.constant 1 : index
    %c0_5 = arith.constant 0 : index
    %6 = vector.load %arg2[%c1_4, %c0_5] : memref<2x128xf32, #tpu.memory_space<vmem>>, vector<1x128xf32>
    %7 = vector.broadcast %1 : vector<8x1xf32> to vector<8x128xf32>
    %8 = vector.broadcast %6 : vector<1x128xf32> to vector<8x128xf32>
    %9 = arith.mulf %7, %8 : vector<8x128xf32>
    %10 = arith.addf %5, %9 : vector<8x128xf32>
    %c0_6 = arith.constant 0 : index
    %c0_7 = arith.constant 0 : index
    %11 = vector.load %arg3[%c0_6, %c0_7] : memref<1x128xf32, #tpu.memory_space<vmem>>, vector<1x128xf32>
    %12 = vector.broadcast %11 : vector<1x128xf32> to vector<8x128xf32>
    %13 = arith.addf %10, %12 : vector<8x128xf32>
    %cst = arith.constant 0.000000e+00 : f32
    %14 = vector.broadcast %cst : f32 to vector<8x128xf32>
    %15 = arith.maximumf %13, %14 : vector<8x128xf32>
    %c0_8 = arith.constant 0 : index
    %c0_9 = arith.constant 0 : index
    %16 = vector.load %arg4[%c0_8, %c0_9] : memref<128x128xf32, #tpu.memory_space<vmem>>, vector<128x128xf32>
    %cst_10 = arith.constant dense<0.000000e+00> : vector<8x128xf32>
    %17 = tpu.matmul %15, %16, %cst_10 {dimension_numbers = #tpu.dot_dimension_numbers<[1], [0], [0], [1], [0, 0, 1, 1], [], []>} : vector<8x128xf32>, vector<128x128xf32>, vector<8x128xf32> -> vector<8x128xf32>
    %c0_11 = arith.constant 0 : index
    %c0_12 = arith.constant 0 : index
    %18 = vector.load %arg5[%c0_11, %c0_12] : memref<1x128xf32, #tpu.memory_space<vmem>>, vector<1x128xf32>
    %19 = vector.broadcast %18 : vector<1x128xf32> to vector<8x128xf32>
    %20 = arith.addf %17, %19 : vector<8x128xf32>
    %cst_13 = arith.constant 0.000000e+00 : f32
    %21 = vector.broadcast %cst_13 : f32 to vector<8x128xf32>
    %22 = arith.maximumf %20, %21 : vector<8x128xf32>
    %c0_14 = arith.constant 0 : index
    %c0_15 = arith.constant 0 : index
    %23 = vector.load %arg6[%c0_14, %c0_15] : memref<1x128xf32, #tpu.memory_space<vmem>>, vector<1x128xf32>
    %24 = vector.broadcast %23 : vector<1x128xf32> to vector<8x128xf32>
    %25 = arith.mulf %22, %24 : vector<8x128xf32>
    %cst_16 = arith.constant dense<0.000000e+00> : vector<8xf32>
    %26 = vector.multi_reduction <add>, %25, %cst_16 [1] : vector<8x128xf32> to vector<8xf32>
    %27 = vector.shape_cast %26 : vector<8xf32> to vector<8x1xf32>
    %c0_17 = arith.constant 0 : index
    %c0_18 = arith.constant 0 : index
    %28 = vector.load %arg7[%c0_17, %c0_18] : memref<1x1xf32, #tpu.memory_space<vmem>>, vector<1x1xf32>
    %29 = vector.broadcast %28 : vector<1x1xf32> to vector<8x1xf32>
    %30 = arith.addf %27, %29 : vector<8x1xf32>
    %c0_19 = arith.constant 0 : index
    %c0_20 = arith.constant 0 : index
    %31 = vector.load %arg8[%c0_19, %c0_20] : memref<8x1xf32, #tpu.memory_space<vmem>>, vector<8x1xf32>
    tpu.vector_store %arg8[%c0_19, %c0_20], %30 {strides = array<i32>} : memref<8x1xf32, #tpu.memory_space<vmem>>, vector<8x1xf32>,
    return
  }
  func.func @transform_0(%arg0: i32) -> (i32, i32) {
    %c0_i32 = arith.constant 0 : i32
    %c0_i32_0 = arith.constant 0 : i32
    return %arg0, %c0_i32 : i32, i32
  }
  func.func @transform_1(%arg0: i32) -> (i32, i32) {
    %c0_i32 = arith.constant 0 : i32
    %c0_i32_0 = arith.constant 0 : i32
    %c0_i32_1 = arith.constant 0 : i32
    return %c0_i32, %c0_i32_0 : i32, i32
  }
  func.func @transform_2(%arg0: i32) -> (i32, i32) {
    %c0_i32 = arith.constant 0 : i32
    %c0_i32_0 = arith.constant 0 : i32
    %c0_i32_1 = arith.constant 0 : i32
    return %c0_i32, %c0_i32_0 : i32, i32
  }
  func.func @transform_3(%arg0: i32) -> (i32, i32) {
    %c0_i32 = arith.constant 0 : i32
    %c0_i32_0 = arith.constant 0 : i32
    %c0_i32_1 = arith.constant 0 : i32
    return %c0_i32, %c0_i32_0 : i32, i32
  }
  func.func @transform_4(%arg0: i32) -> (i32, i32) {
    %c0_i32 = arith.constant 0 : i32
    %c0_i32_0 = arith.constant 0 : i32
    %c0_i32_1 = arith.constant 0 : i32
    return %c0_i32, %c0_i32_0 : i32, i32
  }
  func.func @transform_5(%arg0: i32) -> (i32, i32) {
    %c0_i32 = arith.constant 0 : i32
    %c0_i32_0 = arith.constant 0 : i32
    %c0_i32_1 = arith.constant 0 : i32
    return %c0_i32, %c0_i32_0 : i32, i32
  }
  func.func @transform_6(%arg0: i32) -> (i32, i32) {
    %c0_i32 = arith.constant 0 : i32
    %c0_i32_0 = arith.constant 0 : i32
    %c0_i32_1 = arith.constant 0 : i32
    return %c0_i32, %c0_i32_0 : i32, i32
  }
  func.func @transform_7(%arg0: i32) -> (i32, i32) {
    %c0_i32 = arith.constant 0 : i32
    %c0_i32_0 = arith.constant 0 : i32
    return %arg0, %c0_i32 : i32, i32
  }
}

</mosaic_0001>

<bundles_post_ra>
// kernel: function_approximation_forward.1
= control target key start
LH: loop header
LB: loop body
LE: loop exit
PB: predicated region body
PF: predicated region fallthrough
CT: control target
= control target key end

     0   :  { %s393_s0 = inlined_call_operand.vmem [shape: f32[8,2], index: 0, kind: input, shape index: {}]   ;;  %s394_s1 = inlined_call_operand.vmem [shape: f32[2,128], index: 1, kind: input, shape index: {}]   ;;  %s395_s2 = inlined_call_operand.vmem [shape: f32[1,128], index: 2, kind: input, shape index: {}]   ;;  %s396_s3 = inlined_call_operand.hbm [shape: f32[128,128], index: 3, kind: input, shape index: {}]   ;;  %s397_s4 = inlined_call_operand.vmem [shape: f32[1,128], index: 4, kind: input, shape index: {}]   ;;  %s398_s5 = inlined_call_operand.vmem [shape: f32[1,128], index: 5, kind: input, shape index: {}]   ;;  %s399_s6 = inlined_call_operand.<no memory space> [shape: f32[1,1], index: 6, kind: input, shape index: {}]   ;;  %s400_s7 = inlined_call_operand.vmem [shape: f32[8,1], index: 7, kind: output, shape index: {}]  }
   0x1   :  { %v12_v0 = vstv %s399_s6 }
   0x2   :  { %13 = vst [vmem:[#allocation2] sm:$0x1] %v12_v0 }
   0x3   :  { %14 = vsyncpa [#allocation4], 0  ;;  %s309_s26 = smov [#allocation3]   ;;  %s285_s30 = scalar_lea.hbm %s396_s3, 2048 }
   0x4   :  { %s26_s27 = sshll.u32 %s309_s26, 4  ;;  %p286_p0 = scmp.ne.s32.totalorder %s396_s3, %s285_s30  ;;  %s27_s27 = int_to_ptr.vmem [resolvable:$true] %s26_s27 }
   0x5   :  { %p289_p1 = scmp.lt.u32.totalorder %s285_s30, %s396_s3 }
   0x7   :  { %p291_p2 = pnand %p289_p1, %p286_p0 }
   0x9   :  { %294 = shalt.err (!%p291_p2)
}
   0xa   :  { %s295_s6 = scalar_lea.vmem %s27_s27, 2048  ;;  %p300_p4 = scmp.lt.s32.totalorder %s27_s27, %s27_s27 }
   0xb   :  { %p296_p3 = scmp.ne.s32.totalorder %s27_s27, %s295_s6  ;;  %p301_p5 = scmp.lt.s32.totalorder %s295_s6, %s295_s6 }
   0xd   :  { %p302_p6 = por %p301_p5, %p300_p4 }
   0xf   :  { %p303_p7 = pnand %p302_p6, %p296_p3 }
  0x11   :  { %306 = shalt.err (!%p303_p7)
}
  0x12   :  { %s310_s12 = smov 128   ;;  %s311_s13 = smov 8  }
  0x13   :  { %32 = dma.hbm_to_vmem [thread:$0]  %s396_s3, 2048, %s27_s27, [#allocation4], %s310_s12, %s310_s12, %s311_s13  }
  0x14   :  { %307 = dma.done.wait [#allocation4], 2048  }
  0x15   :  { %308 = vsyncadd [#allocation4], 4294965248  ;;  %v312_v1 = vmov 0   ;;  %v313_v2 = vmov 0.0|0.0   ;;  %v42_v3 = vld [vmem:[%s393_s0] sm:$0xff]  ;;  %v75_v5 = vld [vmem:[#allocation3 + $0x8] sm:$0xff] }
  0x16   :  { %283 = vset.pattern.permute.xlu0 %v312_v1  ;;  %251 = vmatprep.subr.bf16.mxu0 %v313_v2  ;;  %v74_v4 = vld [vmem:[#allocation3] sm:$0xff]  ;;  %v76_v7 = vld [vmem:[#allocation3 + $0x10] sm:$0xff]  ;;  %v77_v8 = vld [vmem:[#allocation3 + $0x18] sm:$0xff]  ;;  %v314_v12 = vmov 1   ;;  %vm315_vm0 = vmmov 0   ;;  %v316_v16 = vmov 0.0  }
  0x17   :  { %46 = vperm.xlu0 %283, %v42_v3   ;;  %v252_v6 = vpack.c.bf16 %v75_v5, %v74_v4  ;;  %v255_v9 = vpack.c.bf16 %v77_v8, %v76_v7  ;;  %v78_v10 = vld [vmem:[#allocation3 + $0x20] sm:$0xff]  ;;  %v79_v11 = vld [vmem:[#allocation3 + $0x28] sm:$0xff]  ;;  %v80_v14 = vld [vmem:[#allocation3 + $0x30] sm:$0xff]  ;;  %248 = vmatprep.mubr.msk.f32.mxu0 %vm315_vm0, %v316_v16  ;;  %vm186_vm1 = vcmask 7168  }
  0x18   :  { %v258_v13 = vpack.c.bf16 %v79_v11, %v78_v10  ;;  %v81_v15 = vld [vmem:[#allocation3 + $0x38] sm:$0xff]  ;;  %v82_v18 = vld [vmem:[#allocation3 + $0x40] sm:$0xff]  ;;  %v83_v19 = vld [vmem:[#allocation3 + $0x48] sm:$0xff] }
  0x19   :  { %253 = vmatpush3.bf16.msra.mxu0 %v252_v6  ;;  %v261_v17 = vpack.c.bf16 %v81_v15, %v80_v14  ;;  %v264_v20 = vpack.c.bf16 %v83_v19, %v82_v18  ;;  %v84_v21 = vld [vmem:[#allocation3 + $0x50] sm:$0xff]  ;;  %v85_v22 = vld [vmem:[#allocation3 + $0x58] sm:$0xff]  ;;  %v86_v24 = vld [vmem:[#allocation3 + $0x60] sm:$0xff] }
  0x1a   :  { %254 = vmatprep.subr.bf16.mxu0 %v313_v2  ;;  %v267_v23 = vpack.c.bf16 %v85_v22, %v84_v21  ;;  %v87_v25 = vld [vmem:[#allocation3 + $0x68] sm:$0xff]  ;;  %v88_v27 = vld [vmem:[#allocation3 + $0x70] sm:$0xff]  ;;  %v89_v28 = vld [vmem:[#allocation3 + $0x78] sm:$0xff] }
  0x1b   :  { %284 = vset.pattern.permute.xlu0 %v314_v12  ;;  %v270_v26 = vpack.c.bf16 %v87_v25, %v86_v24  ;;  %v273_v29 = vpack.c.bf16 %v89_v28, %v88_v27  ;;  %v193_v31 = vld [vmem:[%s394_s1] ss:$0 sm:$0xff]  ;;  %v194_v32 = vld [vmem:[%s394_s1 + $0x1] ss:$0 sm:$0xff] }
  0x1c   :  { %56 = vperm.xlu0 %284, %v42_v3   ;;  %v195_v36 = vld [vmem:[%s395_s2] ss:$0 sm:$0xff] }
  0x1d   :  { %256 = vmatpush3.bf16.msra.mxu0 %v255_v9  ;;  %v196_v40 = vld [vmem:[%s397_s4] ss:$0 sm:$0xff] }
  0x1e   :  { %257 = vmatprep.subr.bf16.mxu0 %v313_v2  ;;  %v197_v44 = vld [vmem:[%s398_s5] ss:$0 sm:$0xff] }
  0x1f   :  { %v198_v47 = vld [vmem:[#allocation2] ss:$0 sm:$0xff] }
  0x21   :  { %259 = vmatpush3.bf16.msra.mxu0 %v258_v13 }
  0x22   :  { %260 = vmatprep.subr.bf16.mxu0 %v313_v2 }
  0x25   :  { %262 = vmatpush3.bf16.msra.mxu0 %v261_v17 }
  0x26   :  { %263 = vmatprep.subr.bf16.mxu0 %v313_v2 }
  0x29   :  { %265 = vmatpush3.bf16.msra.mxu0 %v264_v20 }
  0x2a   :  { %266 = vmatprep.subr.bf16.mxu0 %v313_v2 }
  0x2d   :  { %268 = vmatpush3.bf16.msra.mxu0 %v267_v23 }
  0x2e   :  { %269 = vmatprep.subr.bf16.mxu0 %v313_v2 }
  0x31   :  { %271 = vmatpush3.bf16.msra.mxu0 %v270_v26 }
  0x32   :  { %272 = vmatprep.subr.bf16.mxu0 %v313_v2 }
  0x35   :  { %274 = vmatpush3.bf16.msra.mxu0 %v273_v29 }
  0x96   :  { %v47_v30 = vpop.permute.xlu0 %46 }
  0x97   :  { %v53_v34 = vmul.f32 %v193_v31, %v47_v30 }
  0x9b   :  { %v57_v33 = vpop.permute.xlu0 %56 }
  0x9c   :  { %v63_v35 = vmul.f32 %v194_v32, %v57_v33 }
  0x9e   :  { %v64_v37 = vadd.f32 %v63_v35, %v53_v34 }
  0xa0   :  { %v72_v38 = vadd.f32 %v195_v36, %v64_v37 }
  0xa2   :  { %v73_v39 = vmax.f32 %v72_v38, 0.0 }
  0xa4   :  { %249 = vmatmul.mubr.f32.vlgmr.msra.gmra.mrb[0].mxu0 %v73_v39 }
 0x177   :  { %v163_v41 = vpop.f32.mrb[0].mxu0 }
 0x178   :  { %v164_v42 = vadd.f32 %v196_v40, %v163_v41  ;;  %v250_v43 = vpop.f32.mrb[1].mxu0 }
 0x17a   :  { %v167_v45 = vmax.f32 %v164_v42, 0.0 }
 0x17c   :  { %v175_v46 = vmul.f32 %v197_v44, %v167_v45 }
 0x17e   :  { %176 = vadd.xlane.f32.xlu1 %v175_v46 }
 0x20b   :  { %v177_v48 = vpop.xlane.xlu1 %176 }
 0x20c   :  { %v185_v49 = vadd.f32 %v198_v47, %v177_v48 }
 0x20e   :  { %187 = vst.msk [vmem:[%s400_s7] sm:$0xff] %vm186_vm1, %v185_v49 }
 0x20f   :  { %192 = vsyncpa [#allocation4], 1 }

</bundles_post_ra>
